<compile_context>
chip_gen: v7x
topology: tpu7x:2x2x1
jax: 0.10.0
libtpu: 0.0.40
codegen_flags: <defaults>
</compile_context>

<pallas_src>
import functools

import jax
import jax.numpy as jnp
from jax.experimental import pallas as pl
from jax.experimental.pallas import tpu as pltpu


def _wass_pixelwise_kernel(s_ref, t_ref, o_ref, acc_ref, *,
                           pixels, tile_p, n_seq, needs_mask):
    """One (C, tile_p) tile: channel softmax for S and T, accumulate the
    elementwise difference; reduce to a partial scalar on the last seq step."""
    par = pl.program_id(1)
    seq = pl.program_id(2)

    @pl.when(seq == 0)
    def _():
        acc_ref[...] = jnp.zeros_like(acc_ref)

    s = s_ref[...].astype(jnp.float32)   # (C, tile_p): channels x pixels
    t = t_ref[...].astype(jnp.float32)

    if needs_mask:
        # Lane tail of the last pixel block: zero the inputs so both softmaxes
        # become the same uniform 1/C there and the difference is exactly 0.
        lane = jax.lax.broadcasted_iota(jnp.int32, s.shape, 1)
        gpix = (par * n_seq + seq) * tile_p + lane
        valid = gpix < pixels
        s = jnp.where(valid, s, 0.0)
        t = jnp.where(valid, t, 0.0)

    # Softmax over the channel axis (axis 0 = sublanes); pixels stay on lanes.
    s = s - jnp.max(s, axis=0, keepdims=True)
    es = jnp.exp(s)
    sm_s = es * pl.reciprocal(jnp.sum(es, axis=0, keepdims=True), approx=True)

    t = t - jnp.max(t, axis=0, keepdims=True)
    et = jnp.exp(t)
    sm_t = et * pl.reciprocal(jnp.sum(et, axis=0, keepdims=True), approx=True)

    # Pure elementwise accumulation in the hot loop (VPU only).
    acc_ref[...] += sm_s - sm_t

    @pl.when(seq == n_seq - 1)
    def _():
        # Single cross-lane/sublane reduce per (n, par) chunk.
        o_ref[...] = jnp.sum(acc_ref[...]).reshape(1, 1)


def _choose_tile_p(P, C, itemsize):
    """Largest lane-dense pixel tile that keeps the pipeline inside a ~16 MiB
    VMEM budget: 2 inputs x 2 buffers (input dtype) + 1 f32 accumulator."""
    c_pad = max(8, ((C + 7) // 8) * 8)
    bytes_per_lane = c_pad * (4 * itemsize + 4)
    budget = 16 * 1024 * 1024
    cap = min(16 * 1024, max(128, (budget // bytes_per_lane) // 128 * 128))
    if P <= cap:
        return P, 1          # whole pixel axis in one block (full-dim allowed)
    return cap, pl.cdiv(P, cap)


def criterion_wass_pixelwise(preds_S, preds_T):
    """preds_S, preds_T: (N, C, W, H) like the PyTorch module. Returns scalar."""
    N, C, W, H = preds_S.shape
    P = W * H
    M = N * P

    # Free reshape (contiguous, no data movement): NCHW -> (N, C, P).
    s3d = preds_S.reshape(N, C, P)
    t3d = preds_T.reshape(N, C, P)

    tile_p, n_p = _choose_tile_p(P, C, jnp.dtype(preds_S.dtype).itemsize)
    n_par = 2 if (n_p >= 2 and n_p % 2 == 0) else 1   # extra parallel splits
    n_seq = n_p // n_par
    needs_mask = (n_p * tile_p != P)

    kernel = functools.partial(
        _wass_pixelwise_kernel,
        pixels=P, tile_p=tile_p, n_seq=n_seq, needs_mask=needs_mask)

    def in_map(n, par, seq):
        return (n, 0, par * n_seq + seq)

    partials = pl.pallas_call(
        kernel,
        out_shape=jax.ShapeDtypeStruct((N, n_par, 1, 1), jnp.float32),
        grid_spec=pltpu.PrefetchScalarGridSpec(
            num_scalar_prefetch=0,
            grid=(N, n_par, n_seq),
            in_specs=[
                pl.BlockSpec((None, C, tile_p), in_map),
                pl.BlockSpec((None, C, tile_p), in_map),
            ],
            out_specs=pl.BlockSpec((None, None, 1, 1),
                                   lambda n, par, seq: (n, par, 0, 0)),
            scratch_shapes=[pltpu.VMEM((C, tile_p), jnp.float32)],
        ),
        compiler_params=pltpu.CompilerParams(
            dimension_semantics=("parallel", "parallel", "arbitrary"),
            vmem_limit_bytes=32 * 1024 * 1024,
        ),
    )(s3d, t3d)

    # Partial sums over pixels -> mean over all M pixel rows, summed over C.
    return jnp.sum(partials) / jnp.float32(M)


def _reference(preds_S, preds_T):
    N, C, W, H = preds_S.shape
    s = jnp.transpose(preds_S, (0, 2, 3, 1)).reshape(-1, C)
    t = jnp.transpose(preds_T, (0, 2, 3, 1)).reshape(-1, C)
    sm_s = jax.nn.softmax(s, axis=1)
    sm_t = jax.nn.softmax(t, axis=1)
    meanT = -jnp.mean(sm_t, axis=0)
    meanS = jnp.mean(sm_s, axis=0)
    return jnp.sum(meanT + meanS)


if __name__ == "__main__":
    key = jax.random.PRNGKey(0)
    k1, k2 = jax.random.split(key)
    N, C, W, H = 2, 4, 16, 16
    preds_S = jax.random.normal(k1, (N, C, W, H), dtype=jnp.float32)
    preds_T = jax.random.normal(k2, (N, C, W, H), dtype=jnp.float32)

    loss_fn = jax.jit(criterion_wass_pixelwise)
    loss = jax.block_until_ready(loss_fn(preds_S, preds_T))
    ref = jax.block_until_ready(_reference(preds_S, preds_T))

    # The loss is mathematically 0; both values are rounding noise around 0.
    # approx=True reciprocal adds ~1e-4-level noise, so compare with 2e-3.
    assert jnp.allclose(loss, ref, atol=2e-3), (loss, ref)
    print("KERNEL_OK")
</pallas_src>

<mosaic_0001>
module attributes {stable_mosaic.version = 11 : i64} {
  func.func @_wass_pixelwise_kernel(%arg0: i32, %arg1: i32, %arg2: i32, %arg3: memref<1x4x256xf32, #tpu.memory_space<vmem>>, %arg4: memref<1x4x256xf32, #tpu.memory_space<vmem>>, %arg5: memref<1x1x1x1xf32, #tpu.memory_space<vmem>>, %arg6: memref<4x256xf32, #tpu.memory_space<vmem>>) attributes {dimension_semantics = [#tpu.dimension_semantics<parallel>, #tpu.dimension_semantics<parallel>, #tpu.dimension_semantics<arbitrary>], iteration_bounds = array<i64: 2, 1, 1>, scalar_prefetch = 0 : i64, scratch_operands = 1 : i64, tpu.core_type = #tpu.core_type<tc>, window_params = [{transform_indices = @transform_0, window_bounds = array<i64: 1, 4, 256>}, {transform_indices = @transform_1, window_bounds = array<i64: 1, 4, 256>}, {transform_indices = @transform_2, window_bounds = array<i64: 1, 1, 1, 1>}]} {
    %c0_i32 = arith.constant 0 : i32
    %0 = arith.cmpi eq, %arg2, %c0_i32 : i32
    %1 = arith.extui %0 : i1 to i32
    %c0_i32_0 = arith.constant 0 : i32
    %2 = arith.cmpi ne, %1, %c0_i32_0 : i32
    scf.if %2 {
      %cst_15 = arith.constant 0.000000e+00 : f32
      %34 = vector.broadcast %cst_15 : f32 to vector<4x256xf32>
      %c0_16 = arith.constant 0 : index
      %c0_17 = arith.constant 0 : index
      %35 = vector.load %arg6[%c0_16, %c0_17] : memref<4x256xf32, #tpu.memory_space<vmem>>, vector<4x256xf32>
      tpu.vector_store %arg6[%c0_16, %c0_17], %34 {strides = array<i32>} : memref<4x256xf32, #tpu.memory_space<vmem>>, vector<4x256xf32>,
    } else {
    }
    %c0 = arith.constant 0 : index
    %c0_1 = arith.constant 0 : index
    %c0_2 = arith.constant 0 : index
    %3 = vector.load %arg3[%c0, %c0_1, %c0_2] : memref<1x4x256xf32, #tpu.memory_space<vmem>>, vector<1x4x256xf32>
    %4 = vector.shape_cast %3 : vector<1x4x256xf32> to vector<4x256xf32>
    %c0_3 = arith.constant 0 : index
    %c0_4 = arith.constant 0 : index
    %c0_5 = arith.constant 0 : index
    %5 = vector.load %arg4[%c0_3, %c0_4, %c0_5] : memref<1x4x256xf32, #tpu.memory_space<vmem>>, vector<1x4x256xf32>
    %6 = vector.shape_cast %5 : vector<1x4x256xf32> to vector<4x256xf32>
    %cst = arith.constant dense<0xFF800000> : vector<256xf32>
    %7 = vector.multi_reduction <maximumf>, %4, %cst [0] : vector<4x256xf32> to vector<256xf32>
    %8 = vector.shape_cast %7 : vector<256xf32> to vector<1x256xf32>
    %9 = vector.broadcast %8 : vector<1x256xf32> to vector<4x256xf32>
    %10 = arith.subf %4, %9 : vector<4x256xf32>
    %11 = math.exp %10 : vector<4x256xf32>
    %cst_6 = arith.constant dense<0.000000e+00> : vector<256xf32>
    %12 = vector.multi_reduction <add>, %11, %cst_6 [0] : vector<4x256xf32> to vector<256xf32>
    %13 = vector.shape_cast %12 : vector<256xf32> to vector<1x256xf32>
    %14 = tpu.reciprocal %13 {approx = true} : vector<1x256xf32> -> vector<1x256xf32>
    %15 = vector.broadcast %14 : vector<1x256xf32> to vector<4x256xf32>
    %16 = arith.mulf %11, %15 : vector<4x256xf32>
    %cst_7 = arith.constant dense<0xFF800000> : vector<256xf32>
    %17 = vector.multi_reduction <maximumf>, %6, %cst_7 [0] : vector<4x256xf32> to vector<256xf32>
    %18 = vector.shape_cast %17 : vector<256xf32> to vector<1x256xf32>
    %19 = vector.broadcast %18 : vector<1x256xf32> to vector<4x256xf32>
    %20 = arith.subf %6, %19 : vector<4x256xf32>
    %21 = math.exp %20 : vector<4x256xf32>
    %cst_8 = arith.constant dense<0.000000e+00> : vector<256xf32>
    %22 = vector.multi_reduction <add>, %21, %cst_8 [0] : vector<4x256xf32> to vector<256xf32>
    %23 = vector.shape_cast %22 : vector<256xf32> to vector<1x256xf32>
    %24 = tpu.reciprocal %23 {approx = true} : vector<1x256xf32> -> vector<1x256xf32>
    %25 = vector.broadcast %24 : vector<1x256xf32> to vector<4x256xf32>
    %26 = arith.mulf %21, %25 : vector<4x256xf32>
    %c0_9 = arith.constant 0 : index
    %c0_10 = arith.constant 0 : index
    %27 = vector.load %arg6[%c0_9, %c0_10] : memref<4x256xf32, #tpu.memory_space<vmem>>, vector<4x256xf32>
    %28 = arith.subf %16, %26 : vector<4x256xf32>
    %29 = arith.addf %27, %28 : vector<4x256xf32>
    %c0_11 = arith.constant 0 : index
    %c0_12 = arith.constant 0 : index
    %30 = vector.load %arg6[%c0_11, %c0_12] : memref<4x256xf32, #tpu.memory_space<vmem>>, vector<4x256xf32>
    tpu.vector_store %arg6[%c0_11, %c0_12], %29 {strides = array<i32>} : memref<4x256xf32, #tpu.memory_space<vmem>>, vector<4x256xf32>,
    %c0_i32_13 = arith.constant 0 : i32
    %31 = arith.cmpi eq, %arg2, %c0_i32_13 : i32
    %32 = arith.extui %31 : i1 to i32
    %c0_i32_14 = arith.constant 0 : i32
    %33 = arith.cmpi ne, %32, %c0_i32_14 : i32
    scf.if %33 {
      %c0_15 = arith.constant 0 : index
      %c0_16 = arith.constant 0 : index
      %34 = vector.load %arg6[%c0_15, %c0_16] : memref<4x256xf32, #tpu.memory_space<vmem>>, vector<4x256xf32>
      %35 = vector.shape_cast %34 : vector<4x256xf32> to vector<1x4x256xf32>
      %cst_17 = arith.constant dense<0.000000e+00> : vector<1xf32>
      %36 = vector.multi_reduction <add>, %35, %cst_17 [1, 2] : vector<1x4x256xf32> to vector<1xf32>
      %37 = vector.shape_cast %36 : vector<1xf32> to vector<1x1x1xf32>
      %38 = vector.extract %37[0, 0, 0] : f32 from vector<1x1x1xf32>
      %39 = vector.broadcast %38 : f32 to vector<1x1xf32>
      %c0_18 = arith.constant 0 : index
      %c0_19 = arith.constant 0 : index
      %c0_20 = arith.constant 0 : index
      %c0_21 = arith.constant 0 : index
      %40 = vector.load %arg5[%c0_18, %c0_19, %c0_20, %c0_21] : memref<1x1x1x1xf32, #tpu.memory_space<vmem>>, vector<1x1x1x1xf32>
      %41 = vector.shape_cast %40 : vector<1x1x1x1xf32> to vector<1x1xf32>
      %42 = vector.shape_cast %39 : vector<1x1xf32> to vector<1x1x1x1xf32>
      tpu.vector_store %arg5[%c0_18, %c0_19, %c0_20, %c0_21], %42 {strides = array<i32>} : memref<1x1x1x1xf32, #tpu.memory_space<vmem>>, vector<1x1x1x1xf32>,
    } else {
    }
    return
  }
  func.func @transform_0(%arg0: i32, %arg1: i32, %arg2: i32) -> (i32, i32, i32) {
    %c1_i32 = arith.constant 1 : i32
    %0 = arith.muli %arg1, %c1_i32 : i32
    %1 = arith.addi %0, %arg2 : i32
    %c0_i32 = arith.constant 0 : i32
    %c0_i32_0 = arith.constant 0 : i32
    return %arg0, %c0_i32, %1 : i32, i32, i32
  }
  func.func @transform_1(%arg0: i32, %arg1: i32, %arg2: i32) -> (i32, i32, i32) {
    %c1_i32 = arith.constant 1 : i32
    %0 = arith.muli %arg1, %c1_i32 : i32
    %1 = arith.addi %0, %arg2 : i32
    %c0_i32 = arith.constant 0 : i32
    %c0_i32_0 = arith.constant 0 : i32
    return %arg0, %c0_i32, %1 : i32, i32, i32
  }
  func.func @transform_2(%arg0: i32, %arg1: i32, %arg2: i32) -> (i32, i32, i32, i32) {
    %c0_i32 = arith.constant 0 : i32
    %c0_i32_0 = arith.constant 0 : i32
    %c0_i32_1 = arith.constant 0 : i32
    return %arg0, %arg1, %c0_i32, %c0_i32_0 : i32, i32, i32, i32
  }
}

</mosaic_0001>

<bundles_post_ra>
// kernel: criterion_wass_pixelwise.1
= control target key start
LH: loop header
LB: loop body
LE: loop exit
PB: predicated region body
PF: predicated region fallthrough
CT: control target
= control target key end

     0   :  { %s547_s9 = smov 0   ;;  %s549_s10 = smov 0   ;;  %s597_s0 = inlined_call_operand.vmem [shape: f32[2,4,256], index: 0, kind: input, shape index: {}]   ;;  %s598_s1 = inlined_call_operand.vmem [shape: f32[2,4,256], index: 1, kind: input, shape index: {}]   ;;  %s599_s2 = inlined_call_operand.vmem [shape: f32[2,1,1,1], index: 2, kind: output, shape index: {}]  }
   0x1   :  { %s551_s11 = smov 0  }
   0x2 LB: > { %s31_s12 = sadd.s32 1, %s526_s10  ;;  %p459_p0 = scmp.ge.s32.totalorder %s530_s11, 1  ;;  %s530_s11 = sphi %s551_s11, %s12_s11   ;;  %s526_s10 = sphi %s549_s10, %s601_s10   ;;  %s522_s9 = sphi %s547_s9, %s600_s9  }
   0x3   : > { %p33_p1 = scmp.ge.s32.totalorder %s31_s12, 2  ;;  %p165_p2 = scmp.lt.s32.totalorder %s530_s11, 3 }
   0x5   : > { %s603_s12 = smov (%p33_p1, %s31_s12), 0  ;;  %p166_p3 = pnand %p459_p0, %p165_p2 }
   0x6   : > { %p205_p4 = scmp.lt.s32.totalorder (!%p166_p3), %s522_s9, 1  ;;  %vm243_vm0 = vcmask (!%p166_p3), 1043456   ;;  %vm361_vm1 = vcmask (!%p166_p3), 0  }
   0x7   : > { %169 = sbr.rel (%p166_p3) target bundleno = 294 (0x126), region = 28 }
   0xe   : > { %s605_s9 = smov (!%p205_p4, %s522_s9), 1 }
   0xf   : > { %s466_s13 = sshll.u32 %s605_s9, 3  ;;  %s232_s22 = scalar_lea.vmem %s599_s2, %s605_s9 }
  0x10   : > { %s212_s16 = scalar_lea.vmem %s597_s0, %s466_s13  ;;  %s224_s19 = scalar_lea.vmem %s598_s1, %s466_s13 }
  0x11   : > { %v238_v0 = vld [vmem:[%s212_s16] sm:$0xff] }
  0x12   : > { %v239_v1 = vld [vmem:[%s224_s19] sm:$0xff]  ;;  %v241_v2 = vcombine.high %v238_v0, %v238_v0  ;;  %v244_v3 = vsel %vm243_vm0, %v238_v0, -inf }
  0x13   : > { %v290_v4 = vcombine.high %v239_v1, %v239_v1  ;;  %v292_v5 = vsel %vm243_vm0, %v239_v1, -inf  ;;  %v245_v6 = vrot.slane %v244_v3, 4 }
  0x14   : > { %v293_v7 = vrot.slane %v292_v5, 4  ;;  %v251_v8 = vsel %vm243_vm0, %v241_v2, -inf }
  0x15   : > { %v299_v9 = vsel %vm243_vm0, %v290_v4, -inf  ;;  %v246_v10 = vmax.f32 %v244_v3, %v245_v6  ;;  %v252_v11 = vrot.slane %v251_v8, 4 }
  0x16   : > { %v294_v12 = vmax.f32 %v292_v5, %v293_v7  ;;  %v300_v13 = vrot.slane %v299_v9, 4 }
  0x17   : > { %v247_v14 = vrot.slane %v246_v10, 2  ;;  %v253_v15 = vmax.f32 %v251_v8, %v252_v11 }
  0x18   : > { %v295_v16 = vrot.slane %v294_v12, 2  ;;  %v301_v17 = vmax.f32 %v299_v9, %v300_v13 }
  0x19   : > { %v248_v18 = vmax.f32 %v246_v10, %v247_v14  ;;  %v254_v19 = vrot.slane %v253_v15, 2 }
  0x1a   : > { %v296_v20 = vmax.f32 %v294_v12, %v295_v16  ;;  %v302_v21 = vrot.slane %v301_v17, 2 }
  0x1b   : > { %v249_v22 = vrot.slane %v248_v18, 1  ;;  %v255_v23 = vmax.f32 %v253_v15, %v254_v19 }
  0x1c   : > { %v297_v24 = vrot.slane %v296_v20, 1  ;;  %v303_v25 = vmax.f32 %v301_v17, %v302_v21 }
  0x1d   : > { %v250_v26 = vmax.f32 %v248_v18, %v249_v22  ;;  %v256_v27 = vrot.slane %v255_v23, 1 }
  0x1e   : > { %v298_v28 = vmax.f32 %v296_v20, %v297_v24  ;;  %v304_v29 = vrot.slane %v303_v25, 1 }
  0x1f   : > { %v257_v30 = vmax.f32 %v255_v23, %v256_v27 }
  0x20   : > { %v305_v31 = vmax.f32 %v303_v25, %v304_v29 }
  0x21   : > { %v260_v32 = vcombine.low %v250_v26, %v257_v30 }
  0x22   : > { %v308_v33 = vcombine.low %v298_v28, %v305_v31 }
  0x23   : > { %v262_v34 = vsub.f32 %v238_v0, %v260_v32 }
  0x24   : > { %v310_v35 = vsub.f32 %v239_v1, %v308_v33 }
  0x25   : > { %v263_v36 = vmul.f32 1.442695, %v262_v34 }
  0x26   : > { %v311_v37 = vmul.f32 1.442695, %v310_v35 }
  0x27   : > { %496 = vpow2.f32 %v263_v36 }
  0x28   : > { %498 = vpow2.f32 %v311_v37 }
  0x31   : > { %v497_v38 = vpop.eup %496 }
  0x32   : > { %v499_v39 = vpop.eup %498  ;;  %v266_v40 = vcombine.high %v497_v38, %v497_v38  ;;  %v268_v41 = vsel %vm243_vm0, %v497_v38, 0.0 }
  0x33   : > { %v269_v42 = vrot.slane %v268_v41, 4  ;;  %v314_v43 = vcombine.high %v499_v39, %v499_v39  ;;  %v316_v44 = vsel %vm243_vm0, %v499_v39, 0.0 }
  0x34   : > { %v275_v45 = vsel %vm243_vm0, %v266_v40, 0.0  ;;  %v317_v46 = vrot.slane %v316_v44, 4 }
  0x35   : > { %v270_v47 = vadd.f32 %v269_v42, %v268_v41  ;;  %v276_v48 = vrot.slane %v275_v45, 4  ;;  %v323_v49 = vsel %vm243_vm0, %v314_v43, 0.0 }
  0x36   : > { %v318_v50 = vadd.f32 %v317_v46, %v316_v44  ;;  %v324_v51 = vrot.slane %v323_v49, 4 }
  0x37   : > { %v271_v52 = vrot.slane %v270_v47, 2  ;;  %v277_v53 = vadd.f32 %v276_v48, %v275_v45 }
  0x38   : > { %v319_v54 = vrot.slane %v318_v50, 2  ;;  %v325_v55 = vadd.f32 %v324_v51, %v323_v49 }
  0x39   : > { %v272_v56 = vadd.f32 %v271_v52, %v270_v47  ;;  %v278_v57 = vrot.slane %v277_v53, 2 }
  0x3a   : > { %v320_v58 = vadd.f32 %v319_v54, %v318_v50  ;;  %v326_v59 = vrot.slane %v325_v55, 2 }
  0x3b   : > { %v273_v60 = vrot.slane %v272_v56, 1  ;;  %v279_v61 = vadd.f32 %v278_v57, %v277_v53 }
  0x3c   : > { %v321_v62 = vrot.slane %v320_v58, 1  ;;  %v327_v63 = vadd.f32 %v326_v59, %v325_v55 }
  0x3d   : > { %v274_v0 = vadd.f32 %v273_v60, %v272_v56  ;;  %v280_v1 = vrot.slane %v279_v61, 1 }
  0x3e   : > { %v322_v2 = vadd.f32 %v321_v62, %v320_v58  ;;  %v328_v3 = vrot.slane %v327_v63, 1 }
  0x3f   : > { %v281_v4 = vadd.f32 %v280_v1, %v279_v61  ;;  %500 = vrcp.f32 %v274_v0 }
  0x40   : > { %v329_v5 = vadd.f32 %v328_v3, %v327_v63  ;;  %502 = vrcp.f32 %v322_v2 }
  0x41   : > { %504 = vrcp.f32 %v281_v4 }
  0x42   : > { %506 = vrcp.f32 %v329_v5 }
  0x49   : > { %v501_v6 = vpop.eup %500 }
  0x4a   : > { %v503_v7 = vpop.eup %502 }
  0x4b   : > { %v505_v8 = vpop.eup %504 }
  0x4c   : > { %v507_v9 = vpop.eup %506  ;;  %v286_v10 = vcombine.low %v501_v6, %v505_v8 }
  0x4d   : > { %v334_v11 = vcombine.low %v503_v7, %v507_v9 }
  0x4e   : > { %v288_v12 = vmul.f32 %v497_v38, %v286_v10 }
  0x4f   : > { %v336_v13 = vmul.f32 %v499_v39, %v334_v11 }
  0x51   : > { %v338_v14 = vsub.f32 %v288_v12, %v336_v13 }
  0x53   : > { %v346_v15 = vcombine.high %v338_v14, %v338_v14  ;;  %v348_v16 = vsel %vm243_vm0, %v338_v14, 0.0 }
  0x55   : > { %v349_v17 = vsel %vm243_vm0, %v346_v15, 0.0 }
  0x56   : > { %v350_v18 = vadd.f32 %v349_v17, %v348_v16 }
  0x58   : > { %351 = vadd.xlane.f32.xlu0 %v350_v18 }
  0xe5   : > { %v352_v19 = vpop.xlane.xlu0 %351 }
  0xe6   : > { %v353_v20 = vrot.slane %v352_v19, 4 }
  0xe8   : > { %v354_v21 = vadd.f32 %v353_v20, %v352_v19 }
  0xea   : > { %v355_v22 = vrot.slane %v354_v21, 2 }
  0xec   : > { %v356_v23 = vadd.f32 %v355_v22, %v354_v21 }
  0xee   : > { %v357_v24 = vrot.slane %v356_v23, 1 }
  0xf0   : > { %v358_v25 = vadd.f32 %v357_v24, %v356_v23 }
  0xf2   : > { %468 = vpush %v358_v25 }
 0x123   : > { %s469_s23 = spop %468 }
 0x124   : > { %v360_v26 = vstv %s469_s23 }
 0x125   : > { %362 = vst.msk [vmem:[%s232_s22] sm:$0x1] %vm361_vm1, %v360_v26 }
 0x126 PF: > { %s12_s11 = sadd.s32 1, %s530_s11   ;;  %s600_s9 = smov %s526_s10 }
 0x127   : > { %p9_p5 = scmp.ge.s32.totalorder %s12_s11, 4   ;;  %s601_s10 = smov %s603_s12 }
 0x129   :  { %11 = sbr.rel (!%p9_p5) target bundleno = 2 (0x2), region = 69 }

</bundles_post_ra>
